<compile_context>
chip_gen: v7x
topology: tpu7x:2x2x1
jax: 0.10.0
libtpu: 0.0.40
codegen_flags: <defaults>
</compile_context>

<pallas_src>
import functools

import jax
import jax.numpy as jnp
from jax.experimental import pallas as pl
from jax.experimental.pallas import tpu as pltpu


def _round_up(x: int, m: int) -> int:
    return ((x + m - 1) // m) * m


def _pad_to(a, rows, cols):
    """Zero-pad a 2-D array up to (rows, cols)."""
    r, c = a.shape
    if r == rows and c == cols:
        return a
    return jnp.pad(a, ((0, rows - r), (0, cols - c)))


# ---------------------------------------------------------------------------
# Kernel
# ---------------------------------------------------------------------------
def mlp_kernel(
    x1_ref, x2_ref,
    w11_ref, b11_ref,
    w12_ref, b12_ref,
    w2a_ref, w2b_ref, b2_ref,
    w3_ref, b3_ref,
    w4_ref, b4_ref,
    out_ref,
):
    x1 = x1_ref[...]
    x2 = x2_ref[...]

    # fc11 / fc12 + ReLU (bf16 MXU matmul, f32 accumulation)
    l11 = jnp.maximum(
        jnp.dot(x1, w11_ref[...], preferred_element_type=jnp.float32) + b11_ref[...],
        0.0,
    )
    l12 = jnp.maximum(
        jnp.dot(x2, w12_ref[...], preferred_element_type=jnp.float32) + b12_ref[...],
        0.0,
    )

    # fc2 over the (virtual) concatenation: split-weight matmul == cat + matmul
    l2 = jnp.maximum(
        jnp.dot(l11.astype(jnp.bfloat16), w2a_ref[...], preferred_element_type=jnp.float32)
        + jnp.dot(l12.astype(jnp.bfloat16), w2b_ref[...], preferred_element_type=jnp.float32)
        + b2_ref[...],
        0.0,
    )

    # fc3 + ReLU
    l3 = jnp.maximum(
        jnp.dot(l2.astype(jnp.bfloat16), w3_ref[...], preferred_element_type=jnp.float32)
        + b3_ref[...],
        0.0,
    )

    # fc4 + sigmoid
    logits = (
        jnp.dot(l3.astype(jnp.bfloat16), w4_ref[...], preferred_element_type=jnp.float32)
        + b4_ref[...]
    )
    out_ref[...] = jax.nn.sigmoid(logits).astype(out_ref.dtype)


# ---------------------------------------------------------------------------
# One-time parameter preparation (outside the hot path)
# ---------------------------------------------------------------------------
def prepare_params(params):
    """Split fc2, zero-pad lane dims to multiples of 128, cast weights to bf16.

    Returns (kernel_params, out_dim).  Biases stay f32 (added to the f32
    accumulator).  Zero padding is exact: padded activation columns stay 0
    through every ReLU layer, so they contribute nothing downstream.
    """
    (w11, b11, w12, b12, w2, b2, w3, b3, w4, b4) = params
    in_dim, h1 = w11.shape
    h2 = w2.shape[1]
    h3 = w3.shape[1]
    out_dim = w4.shape[1]

    h1p = _round_up(h1, 128)
    h2p = _round_up(h2, 128)
    h3p = _round_up(h3, 128)
    outp = _round_up(out_dim, 128)

    bf16 = jnp.bfloat16
    w11p = _pad_to(w11, in_dim, h1p).astype(bf16)
    w12p = _pad_to(w12, in_dim, h1p).astype(bf16)
    b11p = _pad_to(b11, 1, h1p)
    b12p = _pad_to(b12, 1, h1p)

    # Pre-split fc2 weight (replaces torch.cat + single matmul).
    w2a = _pad_to(w2[:h1, :], h1p, h2p).astype(bf16)
    w2b = _pad_to(w2[h1:, :], h1p, h2p).astype(bf16)
    b2p = _pad_to(b2, 1, h2p)

    w3p = _pad_to(w3, h2p, h3p).astype(bf16)
    b3p = _pad_to(b3, 1, h3p)
    w4p = _pad_to(w4, h3p, outp).astype(bf16)
    b4p = _pad_to(b4, 1, outp)

    kparams = (w11p, b11p, w12p, b12p, w2a, w2b, b2p, w3p, b3p, w4p, b4p)
    return jax.tree.map(lambda a: jax.device_put(a), kparams), out_dim


# ---------------------------------------------------------------------------
# Forward wrapper
# ---------------------------------------------------------------------------
@functools.partial(jax.jit, static_argnames=("out_dim", "block_rows"))
def mlp_forward(x1, x2, kparams, out_dim, block_rows=512):
    (w11, b11, w12, b12, w2a, w2b, b2, w3, b3, w4, b4) = kparams

    batch, in_dim = x1.shape
    h1p = w11.shape[1]
    h2p = w2a.shape[1]
    h3p = w3.shape[1]
    outp = w4.shape[1]

    # Row tile: multiple of 8 (sublane), capped so double-buffered activation
    # tiles stay small even on v7x's 64 MiB VMEM.
    tb = min(block_rows, _round_up(batch, 8))
    b_pad = _round_up(batch, tb)

    x1 = x1.astype(jnp.bfloat16)
    x2 = x2.astype(jnp.bfloat16)
    if b_pad != batch:
        x1 = jnp.pad(x1, ((0, b_pad - batch), (0, 0)))
        x2 = jnp.pad(x2, ((0, b_pad - batch), (0, 0)))

    grid = (pl.cdiv(b_pad, tb),)
    row_map = lambda i: (i, 0)     # batch-tiled operands
    const_map = lambda i: (0, 0)   # weights/biases: VMEM-resident across steps

    in_specs = [
        pl.BlockSpec((tb, in_dim), row_map),          # x1
        pl.BlockSpec((tb, in_dim), row_map),          # x2
        pl.BlockSpec((in_dim, h1p), const_map),       # w11
        pl.BlockSpec((1, h1p), const_map),            # b11
        pl.BlockSpec((in_dim, h1p), const_map),       # w12
        pl.BlockSpec((1, h1p), const_map),            # b12
        pl.BlockSpec((h1p, h2p), const_map),          # w2a
        pl.BlockSpec((h1p, h2p), const_map),          # w2b
        pl.BlockSpec((1, h2p), const_map),            # b2
        pl.BlockSpec((h2p, h3p), const_map),          # w3
        pl.BlockSpec((1, h3p), const_map),            # b3
        pl.BlockSpec((h3p, outp), const_map),         # w4
        pl.BlockSpec((1, outp), const_map),           # b4
    ]
    out_specs = pl.BlockSpec((tb, outp), row_map)

    flops = 2 * b_pad * (2 * in_dim * h1p + 2 * h1p * h2p + h2p * h3p + h3p * outp)
    weight_bytes = sum(
        a.size * a.dtype.itemsize
        for a in (w11, b11, w12, b12, w2a, w2b, b2, w3, b3, w4, b4)
    )
    io_bytes = 2 * b_pad * in_dim * 2 + b_pad * outp * 4
    cost = pl.CostEstimate(
        flops=flops,
        transcendentals=b_pad * outp,
        bytes_accessed=weight_bytes + io_bytes,
    )

    out_padded = pl.pallas_call(
        mlp_kernel,
        out_shape=jax.ShapeDtypeStruct((b_pad, outp), jnp.float32),
        grid_spec=pltpu.PrefetchScalarGridSpec(
            num_scalar_prefetch=0,
            grid=grid,
            in_specs=in_specs,
            out_specs=out_specs,
        ),
        compiler_params=pltpu.CompilerParams(
            dimension_semantics=("parallel",),   # batch grid sharded across TCs (v7x)
        ),
        cost_estimate=cost,
    )(x1, x2, w11, b11, w12, b12, w2a, w2b, b2, w3, b3, w4, b4)

    return out_padded[:batch, :out_dim]


# ---------------------------------------------------------------------------
# Init + pure-JAX reference
# ---------------------------------------------------------------------------
def init_params(key, input_dim, h1, h2, h3, out_dim):
    """PyTorch-Linear-style init: U(-1/sqrt(fan_in), 1/sqrt(fan_in)), f32."""
    def linear(k, fan_in, fan_out):
        kw, kb = jax.random.split(k)
        bound = 1.0 / jnp.sqrt(fan_in)
        w = jax.random.uniform(kw, (fan_in, fan_out), jnp.float32, -bound, bound)
        b = jax.random.uniform(kb, (1, fan_out), jnp.float32, -bound, bound)
        return w, b

    k11, k12, k2, k3, k4 = jax.random.split(key, 5)
    w11, b11 = linear(k11, input_dim, h1)
    w12, b12 = linear(k12, input_dim, h1)
    w2, b2 = linear(k2, h1 * 2, h2)
    w3, b3 = linear(k3, h2, h3)
    w4, b4 = linear(k4, h3, out_dim)
    return (w11, b11, w12, b12, w2, b2, w3, b3, w4, b4)


def reference_forward(x1, x2, params):
    """Pure-JAX f32 reference (mirrors the PyTorch forward exactly, incl. concat)."""
    (w11, b11, w12, b12, w2, b2, w3, b3, w4, b4) = params
    l11 = jax.nn.relu(x1 @ w11 + b11)
    l12 = jax.nn.relu(x2 @ w12 + b12)
    l1 = jnp.concatenate([l11, l12], axis=-1)
    l2 = jax.nn.relu(l1 @ w2 + b2)
    l3 = jax.nn.relu(l2 @ w3 + b3)
    return jax.nn.sigmoid(l3 @ w4 + b4)


if __name__ == "__main__":
    # Module constants (hidden dims are fixed in the PyTorch module).
    embed_dim = 24
    long_lat_embed_dim = 8
    input_dim = embed_dim + long_lat_embed_dim   # 32
    hidden_dim1, hidden_dim2, hidden_dim3 = 400, 100, 20
    output_dim = 1
    batch = 8

    key = jax.random.PRNGKey(0)
    kx1, kx2, kp = jax.random.split(key, 3)
    x1 = jax.random.normal(kx1, (batch, input_dim), jnp.float32)
    x2 = jax.random.normal(kx2, (batch, input_dim), jnp.float32)
    params = init_params(kp, input_dim, hidden_dim1, hidden_dim2, hidden_dim3, output_dim)

    # One-time parameter prep (split / pad / bf16) — outside the hot path.
    kparams, out_dim = prepare_params(params)

    out = mlp_forward(x1, x2, kparams, out_dim)
    jax.block_until_ready(out)

    ref = reference_forward(x1, x2, params)
    assert out.shape == (batch, output_dim), out.shape
    # bf16 weights vs f32 reference -> loose tolerance.
    assert jnp.allclose(out, ref, atol=2e-2, rtol=2e-2), "mismatch vs reference"

    print("KERNEL_OK")
</pallas_src>

<mosaic_0001>
module attributes {stable_mosaic.version = 11 : i64} {
  func.func @mlp_kernel(%arg0: i32, %arg1: memref<8x32xbf16, #tpu.memory_space<vmem>>, %arg2: memref<8x32xbf16, #tpu.memory_space<vmem>>, %arg3: memref<32x512xbf16, #tpu.memory_space<vmem>>, %arg4: memref<1x512xf32, #tpu.memory_space<vmem>>, %arg5: memref<32x512xbf16, #tpu.memory_space<vmem>>, %arg6: memref<1x512xf32, #tpu.memory_space<vmem>>, %arg7: memref<512x128xbf16, #tpu.memory_space<vmem>>, %arg8: memref<512x128xbf16, #tpu.memory_space<vmem>>, %arg9: memref<1x128xf32, #tpu.memory_space<vmem>>, %arg10: memref<128x128xbf16, #tpu.memory_space<vmem>>, %arg11: memref<1x128xf32, #tpu.memory_space<vmem>>, %arg12: memref<128x128xbf16, #tpu.memory_space<vmem>>, %arg13: memref<1x128xf32, #tpu.memory_space<vmem>>, %arg14: memref<8x128xf32, #tpu.memory_space<vmem>>) attributes {dimension_semantics = [#tpu.dimension_semantics<parallel>], iteration_bounds = array<i64: 1>, scalar_prefetch = 0 : i64, scratch_operands = 0 : i64, tpu.core_type = #tpu.core_type<tc>, window_params = [{transform_indices = @transform_0, window_bounds = array<i64: 8, 32>}, {transform_indices = @transform_1, window_bounds = array<i64: 8, 32>}, {pipeline_mode = #tpu.pipeline_mode<synchronous>, transform_indices = @transform_2, window_bounds = array<i64: 32, 512>}, {pipeline_mode = #tpu.pipeline_mode<synchronous>, transform_indices = @transform_3, window_bounds = array<i64: 1, 512>}, {pipeline_mode = #tpu.pipeline_mode<synchronous>, transform_indices = @transform_4, window_bounds = array<i64: 32, 512>}, {pipeline_mode = #tpu.pipeline_mode<synchronous>, transform_indices = @transform_5, window_bounds = array<i64: 1, 512>}, {pipeline_mode = #tpu.pipeline_mode<synchronous>, transform_indices = @transform_6, window_bounds = array<i64: 512, 128>}, {pipeline_mode = #tpu.pipeline_mode<synchronous>, transform_indices = @transform_7, window_bounds = array<i64: 512, 128>}, {pipeline_mode = #tpu.pipeline_mode<synchronous>, transform_indices = @transform_8, window_bounds = array<i64: 1, 128>}, {pipeline_mode = #tpu.pipeline_mode<synchronous>, transform_indices = @transform_9, window_bounds = array<i64: 128, 128>}, {pipeline_mode = #tpu.pipeline_mode<synchronous>, transform_indices = @transform_10, window_bounds = array<i64: 1, 128>}, {pipeline_mode = #tpu.pipeline_mode<synchronous>, transform_indices = @transform_11, window_bounds = array<i64: 128, 128>}, {pipeline_mode = #tpu.pipeline_mode<synchronous>, transform_indices = @transform_12, window_bounds = array<i64: 1, 128>}, {transform_indices = @transform_13, window_bounds = array<i64: 8, 128>}]} {
    %c0 = arith.constant 0 : index
    %c0_0 = arith.constant 0 : index
    %0 = vector.load %arg1[%c0, %c0_0] : memref<8x32xbf16, #tpu.memory_space<vmem>>, vector<8x32xbf16>
    %c0_1 = arith.constant 0 : index
    %c0_2 = arith.constant 0 : index
    %1 = vector.load %arg2[%c0_1, %c0_2] : memref<8x32xbf16, #tpu.memory_space<vmem>>, vector<8x32xbf16>
    %c0_3 = arith.constant 0 : index
    %c0_4 = arith.constant 0 : index
    %2 = vector.load %arg3[%c0_3, %c0_4] : memref<32x512xbf16, #tpu.memory_space<vmem>>, vector<32x512xbf16>
    %cst = arith.constant dense<0.000000e+00> : vector<8x512xf32>
    %3 = tpu.matmul %0, %2, %cst {dimension_numbers = #tpu.dot_dimension_numbers<[1], [0], [0], [1], [0, 0, 1, 1], [], []>} : vector<8x32xbf16>, vector<32x512xbf16>, vector<8x512xf32> -> vector<8x512xf32>
    %c0_5 = arith.constant 0 : index
    %c0_6 = arith.constant 0 : index
    %4 = vector.load %arg4[%c0_5, %c0_6] : memref<1x512xf32, #tpu.memory_space<vmem>>, vector<1x512xf32>
    %5 = vector.broadcast %4 : vector<1x512xf32> to vector<8x512xf32>
    %6 = arith.addf %3, %5 : vector<8x512xf32>
    %cst_7 = arith.constant 0.000000e+00 : f32
    %7 = vector.broadcast %cst_7 : f32 to vector<8x512xf32>
    %8 = arith.maximumf %6, %7 : vector<8x512xf32>
    %c0_8 = arith.constant 0 : index
    %c0_9 = arith.constant 0 : index
    %9 = vector.load %arg5[%c0_8, %c0_9] : memref<32x512xbf16, #tpu.memory_space<vmem>>, vector<32x512xbf16>
    %cst_10 = arith.constant dense<0.000000e+00> : vector<8x512xf32>
    %10 = tpu.matmul %1, %9, %cst_10 {dimension_numbers = #tpu.dot_dimension_numbers<[1], [0], [0], [1], [0, 0, 1, 1], [], []>} : vector<8x32xbf16>, vector<32x512xbf16>, vector<8x512xf32> -> vector<8x512xf32>
    %c0_11 = arith.constant 0 : index
    %c0_12 = arith.constant 0 : index
    %11 = vector.load %arg6[%c0_11, %c0_12] : memref<1x512xf32, #tpu.memory_space<vmem>>, vector<1x512xf32>
    %12 = vector.broadcast %11 : vector<1x512xf32> to vector<8x512xf32>
    %13 = arith.addf %10, %12 : vector<8x512xf32>
    %cst_13 = arith.constant 0.000000e+00 : f32
    %14 = vector.broadcast %cst_13 : f32 to vector<8x512xf32>
    %15 = arith.maximumf %13, %14 : vector<8x512xf32>
    %16 = arith.truncf %8 : vector<8x512xf32> to vector<8x512xbf16>
    %c0_14 = arith.constant 0 : index
    %c0_15 = arith.constant 0 : index
    %17 = vector.load %arg7[%c0_14, %c0_15] : memref<512x128xbf16, #tpu.memory_space<vmem>>, vector<512x128xbf16>
    %cst_16 = arith.constant dense<0.000000e+00> : vector<8x128xf32>
    %18 = tpu.matmul %16, %17, %cst_16 {dimension_numbers = #tpu.dot_dimension_numbers<[1], [0], [0], [1], [0, 0, 1, 1], [], []>} : vector<8x512xbf16>, vector<512x128xbf16>, vector<8x128xf32> -> vector<8x128xf32>
    %19 = arith.truncf %15 : vector<8x512xf32> to vector<8x512xbf16>
    %c0_17 = arith.constant 0 : index
    %c0_18 = arith.constant 0 : index
    %20 = vector.load %arg8[%c0_17, %c0_18] : memref<512x128xbf16, #tpu.memory_space<vmem>>, vector<512x128xbf16>
    %cst_19 = arith.constant dense<0.000000e+00> : vector<8x128xf32>
    %21 = tpu.matmul %19, %20, %cst_19 {dimension_numbers = #tpu.dot_dimension_numbers<[1], [0], [0], [1], [0, 0, 1, 1], [], []>} : vector<8x512xbf16>, vector<512x128xbf16>, vector<8x128xf32> -> vector<8x128xf32>
    %22 = arith.addf %18, %21 : vector<8x128xf32>
    %c0_20 = arith.constant 0 : index
    %c0_21 = arith.constant 0 : index
    %23 = vector.load %arg9[%c0_20, %c0_21] : memref<1x128xf32, #tpu.memory_space<vmem>>, vector<1x128xf32>
    %24 = vector.broadcast %23 : vector<1x128xf32> to vector<8x128xf32>
    %25 = arith.addf %22, %24 : vector<8x128xf32>
    %cst_22 = arith.constant 0.000000e+00 : f32
    %26 = vector.broadcast %cst_22 : f32 to vector<8x128xf32>
    %27 = arith.maximumf %25, %26 : vector<8x128xf32>
    %28 = arith.truncf %27 : vector<8x128xf32> to vector<8x128xbf16>
    %c0_23 = arith.constant 0 : index
    %c0_24 = arith.constant 0 : index
    %29 = vector.load %arg10[%c0_23, %c0_24] : memref<128x128xbf16, #tpu.memory_space<vmem>>, vector<128x128xbf16>
    %cst_25 = arith.constant dense<0.000000e+00> : vector<8x128xf32>
    %30 = tpu.matmul %28, %29, %cst_25 {dimension_numbers = #tpu.dot_dimension_numbers<[1], [0], [0], [1], [0, 0, 1, 1], [], []>} : vector<8x128xbf16>, vector<128x128xbf16>, vector<8x128xf32> -> vector<8x128xf32>
    %c0_26 = arith.constant 0 : index
    %c0_27 = arith.constant 0 : index
    %31 = vector.load %arg11[%c0_26, %c0_27] : memref<1x128xf32, #tpu.memory_space<vmem>>, vector<1x128xf32>
    %32 = vector.broadcast %31 : vector<1x128xf32> to vector<8x128xf32>
    %33 = arith.addf %30, %32 : vector<8x128xf32>
    %cst_28 = arith.constant 0.000000e+00 : f32
    %34 = vector.broadcast %cst_28 : f32 to vector<8x128xf32>
    %35 = arith.maximumf %33, %34 : vector<8x128xf32>
    %36 = arith.truncf %35 : vector<8x128xf32> to vector<8x128xbf16>
    %c0_29 = arith.constant 0 : index
    %c0_30 = arith.constant 0 : index
    %37 = vector.load %arg12[%c0_29, %c0_30] : memref<128x128xbf16, #tpu.memory_space<vmem>>, vector<128x128xbf16>
    %cst_31 = arith.constant dense<0.000000e+00> : vector<8x128xf32>
    %38 = tpu.matmul %36, %37, %cst_31 {dimension_numbers = #tpu.dot_dimension_numbers<[1], [0], [0], [1], [0, 0, 1, 1], [], []>} : vector<8x128xbf16>, vector<128x128xbf16>, vector<8x128xf32> -> vector<8x128xf32>
    %c0_32 = arith.constant 0 : index
    %c0_33 = arith.constant 0 : index
    %39 = vector.load %arg13[%c0_32, %c0_33] : memref<1x128xf32, #tpu.memory_space<vmem>>, vector<1x128xf32>
    %40 = vector.broadcast %39 : vector<1x128xf32> to vector<8x128xf32>
    %41 = arith.addf %38, %40 : vector<8x128xf32>
    %42 = arith.negf %41 : vector<8x128xf32>
    %43 = math.exp %42 : vector<8x128xf32>
    %cst_34 = arith.constant 1.000000e+00 : f32
    %44 = vector.broadcast %cst_34 : f32 to vector<8x128xf32>
    %45 = arith.addf %44, %43 : vector<8x128xf32>
    %46 = arith.divf %44, %45 : vector<8x128xf32>
    %c0_35 = arith.constant 0 : index
    %c0_36 = arith.constant 0 : index
    %47 = vector.load %arg14[%c0_35, %c0_36] : memref<8x128xf32, #tpu.memory_space<vmem>>, vector<8x128xf32>
    tpu.vector_store %arg14[%c0_35, %c0_36], %46 {strides = array<i32>} : memref<8x128xf32, #tpu.memory_space<vmem>>, vector<8x128xf32>,
    return
  }
  func.func @transform_0(%arg0: i32) -> (i32, i32) {
    %c0_i32 = arith.constant 0 : i32
    %c0_i32_0 = arith.constant 0 : i32
    return %arg0, %c0_i32 : i32, i32
  }
  func.func @transform_1(%arg0: i32) -> (i32, i32) {
    %c0_i32 = arith.constant 0 : i32
    %c0_i32_0 = arith.constant 0 : i32
    return %arg0, %c0_i32 : i32, i32
  }
  func.func @transform_2(%arg0: i32) -> (i32, i32) {
    %c0_i32 = arith.constant 0 : i32
    %c0_i32_0 = arith.constant 0 : i32
    %c0_i32_1 = arith.constant 0 : i32
    return %c0_i32, %c0_i32_0 : i32, i32
  }
  func.func @transform_3(%arg0: i32) -> (i32, i32) {
    %c0_i32 = arith.constant 0 : i32
    %c0_i32_0 = arith.constant 0 : i32
    %c0_i32_1 = arith.constant 0 : i32
    return %c0_i32, %c0_i32_0 : i32, i32
  }
  func.func @transform_4(%arg0: i32) -> (i32, i32) {
    %c0_i32 = arith.constant 0 : i32
    %c0_i32_0 = arith.constant 0 : i32
    %c0_i32_1 = arith.constant 0 : i32
    return %c0_i32, %c0_i32_0 : i32, i32
  }
  func.func @transform_5(%arg0: i32) -> (i32, i32) {
    %c0_i32 = arith.constant 0 : i32
    %c0_i32_0 = arith.constant 0 : i32
    %c0_i32_1 = arith.constant 0 : i32
    return %c0_i32, %c0_i32_0 : i32, i32
  }
  func.func @transform_6(%arg0: i32) -> (i32, i32) {
    %c0_i32 = arith.constant 0 : i32
    %c0_i32_0 = arith.constant 0 : i32
    %c0_i32_1 = arith.constant 0 : i32
    return %c0_i32, %c0_i32_0 : i32, i32
  }
  func.func @transform_7(%arg0: i32) -> (i32, i32) {
    %c0_i32 = arith.constant 0 : i32
    %c0_i32_0 = arith.constant 0 : i32
    %c0_i32_1 = arith.constant 0 : i32
    return %c0_i32, %c0_i32_0 : i32, i32
  }
  func.func @transform_8(%arg0: i32) -> (i32, i32) {
    %c0_i32 = arith.constant 0 : i32
    %c0_i32_0 = arith.constant 0 : i32
    %c0_i32_1 = arith.constant 0 : i32
    return %c0_i32, %c0_i32_0 : i32, i32
  }
  func.func @transform_9(%arg0: i32) -> (i32, i32) {
    %c0_i32 = arith.constant 0 : i32
    %c0_i32_0 = arith.constant 0 : i32
    %c0_i32_1 = arith.constant 0 : i32
    return %c0_i32, %c0_i32_0 : i32, i32
  }
  func.func @transform_10(%arg0: i32) -> (i32, i32) {
    %c0_i32 = arith.constant 0 : i32
    %c0_i32_0 = arith.constant 0 : i32
    %c0_i32_1 = arith.constant 0 : i32
    return %c0_i32, %c0_i32_0 : i32, i32
  }
  func.func @transform_11(%arg0: i32) -> (i32, i32) {
    %c0_i32 = arith.constant 0 : i32
    %c0_i32_0 = arith.constant 0 : i32
    %c0_i32_1 = arith.constant 0 : i32
    return %c0_i32, %c0_i32_0 : i32, i32
  }
  func.func @transform_12(%arg0: i32) -> (i32, i32) {
    %c0_i32 = arith.constant 0 : i32
    %c0_i32_0 = arith.constant 0 : i32
    %c0_i32_1 = arith.constant 0 : i32
    return %c0_i32, %c0_i32_0 : i32, i32
  }
  func.func @transform_13(%arg0: i32) -> (i32, i32) {
    %c0_i32 = arith.constant 0 : i32
    %c0_i32_0 = arith.constant 0 : i32
    return %arg0, %c0_i32 : i32, i32
  }
}

</mosaic_0001>

<bundles_post_ra>
// kernel: mlp_forward.1
= control target key start
LH: loop header
LB: loop body
LE: loop exit
PB: predicated region body
PF: predicated region fallthrough
CT: control target
= control target key end

     0   :  { %18 = vsyncpa [#allocation3], 0  ;;  %s2249_s0 = inlined_call_operand.vmem [shape: bf16[8,32], index: 0, kind: input, shape index: {}]   ;;  %s2250_s1 = inlined_call_operand.vmem [shape: bf16[8,32], index: 1, kind: input, shape index: {}]   ;;  %s2251_s2 = inlined_call_operand.hbm [shape: bf16[32,512], index: 2, kind: input, shape index: {}]   ;;  %s2252_s3 = inlined_call_operand.hbm [shape: f32[1,512], index: 3, kind: input, shape index: {}]   ;;  %s2253_s4 = inlined_call_operand.hbm [shape: bf16[32,512], index: 4, kind: input, shape index: {}]   ;;  %s2254_s5 = inlined_call_operand.hbm [shape: f32[1,512], index: 5, kind: input, shape index: {}]   ;;  %s2255_s6 = inlined_call_operand.hbm [shape: bf16[512,128], index: 6, kind: input, shape index: {}]   ;;  %s2256_s7 = inlined_call_operand.hbm [shape: bf16[512,128], index: 7, kind: input, shape index: {}]   ;;  %s2257_s8 = inlined_call_operand.vmem [shape: f32[1,128], index: 8, kind: input, shape index: {}]   ;;  %s2258_s9 = inlined_call_operand.hbm [shape: bf16[128,128], index: 9, kind: input, shape index: {}]   ;;  %s2259_s10 = inlined_call_operand.hbm [shape: f32[1,128], index: 10, kind: input, shape index: {}]   ;;  %s2260_s11 = inlined_call_operand.vmem [shape: bf16[128,128], index: 11, kind: input, shape index: {}]   ;;  %s2261_s12 = inlined_call_operand.vmem [shape: f32[1,128], index: 12, kind: input, shape index: {}]   ;;  %s2262_s13 = inlined_call_operand.vmem [shape: f32[8,128], index: 13, kind: output, shape index: {}]  }
   0x1   :  { %19 = vsyncpa [#allocation5], 0 }
   0x2   :  { %20 = vsyncpa [#allocation8], 0 }
   0x3   :  { %21 = vsyncpa [#allocation11], 0 }
   0x4   :  { %22 = vsyncpa [#allocation14], 0  ;;  %s1958_s25 = smov [#allocation4]   ;;  %s1959_s27 = smov [#allocation7]  }
   0x5   :  { %s45_s26 = sshll.u32 %s1958_s25, 4  ;;  %s67_s28 = sshll.u32 %s1959_s27, 4  ;;  %s46_s26 = int_to_ptr.vmem [resolvable:$true] %s45_s26  ;;  %s68_s28 = int_to_ptr.vmem [resolvable:$true] %s67_s28 }
   0x6   :  { %s1772_s14 = scalar_lea.hbm %s2252_s3, 64 }
   0x7   :  { %p1773_p0 = scmp.ne.s32.totalorder %s2252_s3, %s1772_s14  ;;  %p1776_p1 = scmp.lt.u32.totalorder %s1772_s14, %s2252_s3 }
   0x9   :  { %p1778_p2 = pnand %p1776_p1, %p1773_p0 }
   0xb   :  { %1781 = shalt.err (!%p1778_p2)
}
   0xc   :  { %s1782_s19 = scalar_lea.vmem %s46_s26, 64  ;;  %p1787_p4 = scmp.lt.s32.totalorder %s46_s26, %s46_s26 }
   0xd   :  { %p1783_p3 = scmp.ne.s32.totalorder %s46_s26, %s1782_s19  ;;  %p1788_p5 = scmp.lt.s32.totalorder %s1782_s19, %s1782_s19 }
   0xf   :  { %p1789_p6 = por %p1788_p5, %p1787_p4 }
  0x11   :  { %p1790_p7 = pnand %p1789_p6, %p1783_p3 }
  0x13   :  { %1793 = shalt.err (!%p1790_p7)
}
  0x14   :  { %48 = dma.hbm_to_vmem [thread:$0]  %s2252_s3, 64, %s46_s26, [#allocation5]  }
  0x15   :  { %s1794_s24 = scalar_lea.hbm %s2254_s5, 64 }
  0x16   :  { %p1795_p8 = scmp.ne.s32.totalorder %s2254_s5, %s1794_s24  ;;  %p1798_p9 = scmp.lt.u32.totalorder %s1794_s24, %s2254_s5 }
  0x18   :  { %p1800_p10 = pnand %p1798_p9, %p1795_p8 }
  0x1a   :  { %1803 = shalt.err (!%p1800_p10)
}
  0x1b   :  { %s1804_s14 = scalar_lea.vmem %s68_s28, 64  ;;  %p1809_p12 = scmp.lt.s32.totalorder %s68_s28, %s68_s28 }
  0x1c   :  { %p1805_p11 = scmp.ne.s32.totalorder %s68_s28, %s1804_s14  ;;  %p1810_p13 = scmp.lt.s32.totalorder %s1804_s14, %s1804_s14 }
  0x1e   :  { %p1811_p0 = por %p1810_p13, %p1809_p12 }
  0x20   :  { %p1812_p1 = pnand %p1811_p0, %p1805_p11 }
  0x22   :  { %1815 = shalt.err (!%p1812_p1)
}
  0x23   :  { %70 = dma.hbm_to_vmem [thread:$0]  %s2254_s5, 64, %s68_s28, [#allocation8]  }
  0x24   :  { %s1960_s15 = smov [#allocation10]   ;;  %s1961_s17 = smov [#allocation2]  }
  0x25   :  { %s88_s16 = sshll.u32 %s1960_s15, 4  ;;  %s32_s18 = sshll.u32 %s1961_s17, 4  ;;  %s89_s16 = int_to_ptr.vmem [resolvable:$true] %s88_s16  ;;  %s2067_s18 = int_to_ptr.vmem [resolvable:$true] %s32_s18 }
  0x26   :  { %s1816_s21 = scalar_lea.hbm %s2256_s7, 4096 }
  0x27   :  { %p1817_p2 = scmp.ne.s32.totalorder %s2256_s7, %s1816_s21  ;;  %p1820_p3 = scmp.lt.u32.totalorder %s1816_s21, %s2256_s7 }
  0x29   :  { %p1822_p4 = pnand %p1820_p3, %p1817_p2 }
  0x2b   :  { %1825 = shalt.err (!%p1822_p4)
}
  0x2c   :  { %s1826_s5 = scalar_lea.vmem %s89_s16, 4096  ;;  %p1831_p6 = scmp.lt.s32.totalorder %s89_s16, %s89_s16 }
  0x2d   :  { %p1827_p5 = scmp.ne.s32.totalorder %s89_s16, %s1826_s5  ;;  %p1832_p7 = scmp.lt.s32.totalorder %s1826_s5, %s1826_s5 }
  0x2f   :  { %p1833_p8 = por %p1832_p7, %p1831_p6 }
  0x31   :  { %p1834_p9 = pnand %p1833_p8, %p1827_p5 }
  0x33   :  { %1837 = shalt.err (!%p1834_p9)
}
  0x34   :  { %s1962_s28 = smov 64   ;;  %s1963_s27 = smov 4  }
  0x35   :  { %94 = dma.hbm_to_vmem [thread:$0]  %s2256_s7, 4096, %s89_s16, [#allocation11], %s1962_s28, %s1962_s28, %s1963_s27  }
  0x36   :  { %s1838_s26 = scalar_lea.hbm %s2251_s2, 1024 }
  0x37   :  { %p1839_p10 = scmp.ne.s32.totalorder %s2251_s2, %s1838_s26  ;;  %p1842_p11 = scmp.lt.u32.totalorder %s1838_s26, %s2251_s2 }
  0x39   :  { %p1844_p12 = pnand %p1842_p11, %p1839_p10 }
  0x3b   :  { %1847 = shalt.err (!%p1844_p12)
}
  0x3c   :  { %s1848_s21 = scalar_lea.vmem %s2067_s18, 1024  ;;  %p1853_p0 = scmp.lt.s32.totalorder %s2067_s18, %s2067_s18 }
  0x3d   :  { %p1849_p13 = scmp.ne.s32.totalorder %s2067_s18, %s1848_s21  ;;  %p1854_p1 = scmp.lt.s32.totalorder %s1848_s21, %s1848_s21 }
  0x3f   :  { %p1855_p2 = por %p1854_p1, %p1853_p0 }
  0x41   :  { %p1856_p3 = pnand %p1855_p2, %p1849_p13 }
  0x43   :  { %1859 = shalt.err (!%p1856_p3)
}
  0x44   :  { %s1964_s7 = smov 256   ;;  %s1965_s16 = smov 16  }
  0x45   :  { %38 = dma.hbm_to_vmem [thread:$0]  %s2251_s2, 1024, %s2067_s18, [#allocation3], %s1964_s7, %s1964_s7, %s1965_s16  }
  0x46   :  { %s1966_s24 = smov [#allocation6]   ;;  %s1967_s5 = smov [#allocation9]  }
  0x47   :  { %s54_s25 = sshll.u32 %s1966_s24, 4  ;;  %s76_s29 = sshll.u32 %s1967_s5, 4  ;;  %s55_s25 = int_to_ptr.vmem [resolvable:$true] %s54_s25  ;;  %s2101_s29 = int_to_ptr.vmem [resolvable:$true] %s76_s29 }
  0x48   :  { %s1860_s3 = scalar_lea.hbm %s2253_s4, 1024 }
  0x49   :  { %p1861_p4 = scmp.ne.s32.totalorder %s2253_s4, %s1860_s3  ;;  %p1864_p5 = scmp.lt.u32.totalorder %s1860_s3, %s2253_s4 }
  0x4b   :  { %p1866_p6 = pnand %p1864_p5, %p1861_p4 }
  0x4d   :  { %1869 = shalt.err (!%p1866_p6)
}
  0x4e   :  { %s1870_s2 = scalar_lea.vmem %s55_s25, 1024  ;;  %p1875_p8 = scmp.lt.s32.totalorder %s55_s25, %s55_s25 }
  0x4f   :  { %p1871_p7 = scmp.ne.s32.totalorder %s55_s25, %s1870_s2  ;;  %p1876_p9 = scmp.lt.s32.totalorder %s1870_s2, %s1870_s2 }
  0x51   :  { %p1877_p10 = por %p1876_p9, %p1875_p8 }
  0x53   :  { %p1878_p11 = pnand %p1877_p10, %p1871_p7 }
  0x55   :  { %1881 = shalt.err (!%p1878_p11)
}
  0x56   :  { %60 = dma.hbm_to_vmem [thread:$0]  %s2253_s4, 1024, %s55_s25, [#allocation5], %s1964_s7, %s1964_s7, %s1965_s16  }
  0x57   :  { %s1882_s23 = scalar_lea.hbm %s2255_s6, 4096 }
  0x58   :  { %p1883_p12 = scmp.ne.s32.totalorder %s2255_s6, %s1882_s23  ;;  %p1886_p13 = scmp.lt.u32.totalorder %s1882_s23, %s2255_s6 }
  0x5a   :  { %p1888_p0 = pnand %p1886_p13, %p1883_p12 }
  0x5c   :  { %1891 = shalt.err (!%p1888_p0)
}
  0x5d   :  { %s1892_s3 = scalar_lea.vmem %s2101_s29, 4096  ;;  %p1897_p2 = scmp.lt.s32.totalorder %s2101_s29, %s2101_s29 }
  0x5e   :  { %p1893_p1 = scmp.ne.s32.totalorder %s2101_s29, %s1892_s3  ;;  %p1898_p3 = scmp.lt.s32.totalorder %s1892_s3, %s1892_s3 }
  0x60   :  { %p1899_p4 = por %p1898_p3, %p1897_p2 }
  0x62   :  { %p1900_p5 = pnand %p1899_p4, %p1893_p1 }
  0x64   :  { %1903 = shalt.err (!%p1900_p5)
}
  0x65   :  { %82 = dma.hbm_to_vmem [thread:$0]  %s2255_s6, 4096, %s2101_s29, [#allocation8], %s1962_s28, %s1962_s28, %s1963_s27  }
  0x66   :  { %s1968_s16 = smov [#allocation12]   ;;  %s1969_s26 = smov [#allocation13]  }
  0x67   :  { %s102_s25 = sshll.u32 %s1968_s16, 4  ;;  %s115_s15 = sshll.u32 %s1969_s26, 4  ;;  %s103_s25 = int_to_ptr.vmem [resolvable:$true] %s102_s25  ;;  %s116_s15 = int_to_ptr.vmem [resolvable:$true] %s115_s15 }
  0x68   :  { %s1904_s2 = scalar_lea.hbm %s2258_s9, 1024 }
  0x69   :  { %p1905_p6 = scmp.ne.s32.totalorder %s2258_s9, %s1904_s2  ;;  %p1908_p7 = scmp.lt.u32.totalorder %s1904_s2, %s2258_s9 }
  0x6b   :  { %p1910_p8 = pnand %p1908_p7, %p1905_p6 }
  0x6d   :  { %1913 = shalt.err (!%p1910_p8)
}
  0x6e   :  { %s1914_s6 = scalar_lea.vmem %s103_s25, 1024  ;;  %p1919_p10 = scmp.lt.s32.totalorder %s103_s25, %s103_s25 }
  0x6f   :  { %p1915_p9 = scmp.ne.s32.totalorder %s103_s25, %s1914_s6  ;;  %p1920_p11 = scmp.lt.s32.totalorder %s1914_s6, %s1914_s6 }
  0x71   :  { %p1921_p12 = por %p1920_p11, %p1919_p10 }
  0x73   :  { %p1922_p13 = pnand %p1921_p12, %p1915_p9 }
  0x75   :  { %1925 = shalt.err (!%p1922_p13)
}
  0x76   :  { %108 = dma.hbm_to_vmem [thread:$0]  %s2258_s9, 1024, %s103_s25, [#allocation11], %s1962_s28, %s1962_s28, %s1963_s27  }
  0x77   :  { %s1926_s30 = scalar_lea.hbm %s2259_s10, 16 }
  0x78   :  { %p1927_p0 = scmp.ne.s32.totalorder %s2259_s10, %s1926_s30  ;;  %p1930_p1 = scmp.lt.u32.totalorder %s1926_s30, %s2259_s10 }
  0x7a   :  { %p1932_p2 = pnand %p1930_p1, %p1927_p0 }
  0x7c   :  { %1935 = shalt.err (!%p1932_p2)
}
  0x7d   :  { %s1936_s16 = scalar_lea.vmem %s116_s15, 16  ;;  %s1940_s26 = scalar_lea.vmem %s116_s15, 32 }
  0x7e   :  { %p1937_p3 = scmp.ne.s32.totalorder %s116_s15, %s1936_s16  ;;  %p1941_p4 = scmp.lt.s32.totalorder %s116_s15, %s116_s15 }
  0x7f   :  { %p1942_p5 = scmp.lt.s32.totalorder %s1940_s26, %s1936_s16 }
  0x81   :  { %p1943_p6 = por %p1942_p5, %p1941_p4 }
  0x83   :  { %p1944_p7 = pnand %p1943_p6, %p1937_p3 }
  0x85   :  { %1947 = shalt.err (!%p1944_p7)
}
  0x86   :  { %118 = dma.hbm_to_vmem [thread:$0]  %s2259_s10, 16, %s116_s15, [#allocation14]  }
  0x87   :  { %1948 = dma.done.wait [#allocation3], 1024  }
  0x88   :  { %1949 = vsyncadd [#allocation3], 4294966272 }
  0x89   :  { %1950 = dma.done.wait [#allocation5], 1088  }
  0x8a   :  { %1951 = vsyncadd [#allocation5], 4294966208 }
  0x8b   :  { %1952 = dma.done.wait [#allocation8], 4160  }
  0x8c   :  { %1953 = vsyncadd [#allocation8], 4294963136 }
  0x8d   :  { %1954 = dma.done.wait [#allocation11], 5120  }
  0x8e   :  { %1955 = vsyncadd [#allocation11], 4294962176 }
  0x8f   :  { %1956 = dma.done.wait [#allocation14], 16  }
  0x90   :  { %1957 = vsyncadd [#allocation14], 4294967280  ;;  %v1970_v0 = vmov 0   ;;  %v1664_v1 = vld [vmem:[#allocation2 + $0x4] ss:$16 sps:$4 sm:$0xff]   ;;  %vm220_vm0 = vcmask 261120   ;;  %v160_v53 = vlaneseq }
  0x91   :  { %256 = vmatprep.mubr.bf16.mxu0 %v1970_v0  ;;  %297 = vmatprep.mubr.bf16.mxu1 %v1970_v0  ;;  %v1666_v2 = vld [vmem:[#allocation2 + $0xc] ss:$16 sps:$4 sm:$0xff]   ;;  %v1668_v3 = vld [vmem:[#allocation2] ss:$16 sps:$4 sm:$0xff]   ;;  %v1669_v4 = vld [vmem:[#allocation2 + $0x8] ss:$16 sps:$4 sm:$0xff]  }
  0x92   :  { %224 = vmatprep.subr.bf16.mxu0 %v1664_v1  ;;  %265 = vmatprep.subr.bf16.mxu1 %v1666_v2  ;;  %v1670_v5 = vld [vmem:[#allocation2 + $0x24] ss:$16 sps:$4 sm:$0xff]   ;;  %v1672_v6 = vld [vmem:[#allocation2 + $0x2c] ss:$16 sps:$4 sm:$0xff]   ;;  %v1674_v7 = vld [vmem:[#allocation2 + $0x20] ss:$16 sps:$4 sm:$0xff]  }
  0x93   :  { %225 = vmatpush1.bf16.msra.mxu0 %v1668_v3  ;;  %266 = vmatpush1.bf16.msra.mxu1 %v1669_v4  ;;  %v1675_v8 = vld [vmem:[#allocation2 + $0x28] ss:$16 sps:$4 sm:$0xff]   ;;  %v148_v9 = vld [vmem:[%s2249_s0] sm:$0xf]  ;;  %v1676_v10 = vld [vmem:[#allocation6] ss:$16 sps:$4 sm:$0xff]  }
  0x94   :  { %226 = vmatprep.subr.bf16.mxu0 %v1670_v5  ;;  %267 = vmatprep.subr.bf16.mxu1 %v1672_v6  ;;  %v1678_v11 = vld [vmem:[#allocation6 + $0x4] ss:$16 sps:$4 sm:$0xff]   ;;  %v1679_v12 = vld [vmem:[#allocation6 + $0x8] ss:$16 sps:$4 sm:$0xff]   ;;  %v1681_v13 = vld [vmem:[#allocation6 + $0xc] ss:$16 sps:$4 sm:$0xff]  }
  0x95   :  { %v1684_v14 = vld [vmem:[#allocation6 + $0x24] ss:$16 sps:$4 sm:$0xff]   ;;  %v1682_v15 = vld [vmem:[#allocation6 + $0x20] ss:$16 sps:$4 sm:$0xff]   ;;  %v1687_v16 = vld [vmem:[#allocation6 + $0x2c] ss:$16 sps:$4 sm:$0xff]  }
  0x96   :  { %v1685_v17 = vld [vmem:[#allocation6 + $0x28] ss:$16 sps:$4 sm:$0xff]   ;;  %v149_v20 = vld [vmem:[%s2250_s1] sm:$0xf]  ;;  %v1692_v23 = vld [vmem:[#allocation10 + $0x48] sm:$0xff]   ;;  %v2172_v54 = vshrl.u32 %v160_v53, 7 }
  0x97   :  { %227 = vmatpush1.bf16.msra.mxu0 %v1674_v7  ;;  %268 = vmatpush1.bf16.msra.mxu1 %v1675_v8  ;;  %v1688_v18 = vld [vmem:[#allocation10 + $0x40] sm:$0xff]   ;;  %v1693_v24 = vld [vmem:[#allocation10 + $0xc8] sm:$0xff]   ;;  %v1696_v27 = vld [vmem:[#allocation10 + $0x50] sm:$0xff]   ;;  %vm1972_vm1 = vmmov 0  }
  0x98   :  { %383 = vmatprep.subr.bf16.mxu0 %v1678_v11  ;;  %424 = vmatprep.subr.bf16.mxu1 %v1681_v13  ;;  %v1689_v19 = vld [vmem:[#allocation10 + $0xc0] sm:$0xff]   ;;  %v1694_v25 = vld [vmem:[#allocation10 + $0x8] sm:$0xff]   ;;  %v1697_v28 = vld [vmem:[#allocation10 + $0xd0] sm:$0xff]   ;;  %v166_v57 = vsub.s32 1, %v2172_v54  ;;  %v174_v59 = vsub.s32 3, %v2172_v54  ;;  %v162_v1 = vsub.s32 0, %v2172_v54 }
  0x99   :  { %v1690_v21 = vld [vmem:[#allocation10] sm:$0xff]   ;;  %v1695_v26 = vld [vmem:[#allocation10 + $0x88] sm:$0xff]   ;;  %v1698_v29 = vld [vmem:[#allocation10 + $0x10] sm:$0xff]   ;;  %v170_v2 = vsub.s32 2, %v2172_v54 }
  0x9a   :  { %1407 = vmatmul.mubr.msk.bf16.vlgmr.msra.gmra.mrb[0].mxu0 %vm220_vm0, %v148_v9  ;;  %1408 = vmatmul.mubr.msk.bf16.vlgmr.msra.gmra.mrb[0].mxu1 %vm220_vm0, %v148_v9  ;;  %v1691_v22 = vld [vmem:[#allocation10 + $0x80] sm:$0xff]   ;;  %v1699_v30 = vld [vmem:[#allocation10 + $0x90] sm:$0xff]   ;;  %v1700_v31 = vld [vmem:[#allocation10 + $0x58] sm:$0xff]  }
  0x9b   :  { %384 = vmatpush1.bf16.msra.mxu0 %v1676_v10  ;;  %425 = vmatpush1.bf16.msra.mxu1 %v1679_v12  ;;  %v1701_v32 = vld [vmem:[#allocation10 + $0xd8] sm:$0xff]   ;;  %v1704_v35 = vld [vmem:[#allocation10 + $0x60] sm:$0xff]   ;;  %v1708_v39 = vld [vmem:[#allocation10 + $0x68] sm:$0xff]  }
  0x9c   :  { %385 = vmatprep.subr.bf16.mxu0 %v1684_v14  ;;  %426 = vmatprep.subr.bf16.mxu1 %v1687_v16  ;;  %v1702_v33 = vld [vmem:[#allocation10 + $0x18] sm:$0xff]   ;;  %v1705_v36 = vld [vmem:[#allocation10 + $0xe0] sm:$0xff]   ;;  %v1709_v40 = vld [vmem:[#allocation10 + $0xe8] sm:$0xff]  }
  0x9d   :  { %415 = vmatprep.mubr.bf16.mxu0 %v1970_v0  ;;  %456 = vmatprep.mubr.bf16.mxu1 %v1970_v0  ;;  %v1703_v34 = vld [vmem:[#allocation10 + $0x98] sm:$0xff]   ;;  %v1706_v37 = vld [vmem:[#allocation10 + $0x20] sm:$0xff]   ;;  %v1710_v41 = vld [vmem:[#allocation10 + $0x28] sm:$0xff]  }
  0x9e   :  { %v1707_v38 = vld [vmem:[#allocation10 + $0xa0] sm:$0xff]   ;;  %v1711_v42 = vld [vmem:[#allocation10 + $0xa8] sm:$0xff]   ;;  %v1712_v43 = vld [vmem:[#allocation10 + $0x70] sm:$0xff]  }
  0x9f   :  { %386 = vmatpush1.bf16.msra.mxu0 %v1682_v15  ;;  %427 = vmatpush1.bf16.msra.mxu1 %v1685_v17  ;;  %v1713_v44 = vld [vmem:[#allocation10 + $0xf0] sm:$0xff]   ;;  %v1716_v47 = vld [vmem:[#allocation10 + $0x78] sm:$0xff]   ;;  %v1720_v51 = vld [vmem:[#allocation9 + $0x40] sm:$0xff]  }
  0xa0   :  { %1503 = vmatprep.subr.bf16.mxu0 %v1688_v18  ;;  %1525 = vmatprep.subr.bf16.mxu1 %v1689_v19  ;;  %v1714_v45 = vld [vmem:[#allocation10 + $0x30] sm:$0xff]   ;;  %v1717_v48 = vld [vmem:[#allocation10 + $0xf8] sm:$0xff]   ;;  %v1721_v52 = vld [vmem:[#allocation9 + $0xc0] sm:$0xff]  }
  0xa1   :  { %v1715_v46 = vld [vmem:[#allocation10 + $0xb0] sm:$0xff]   ;;  %v1718_v49 = vld [vmem:[#allocation10 + $0x38] sm:$0xff]   ;;  %v1738_v53 = vld [vmem:[#allocation9 + $0x20] sm:$0xff]  }
  0xa2   :  { %1417 = vmatmul.mubr.msk.bf16.vlgmr.msra.gmra.mrb[4].mxu0 %vm220_vm0, %v149_v20  ;;  %1418 = vmatmul.mubr.msk.bf16.vlgmr.msra.gmra.mrb[4].mxu1 %vm220_vm0, %v149_v20  ;;  %v1719_v50 = vld [vmem:[#allocation10 + $0xb8] sm:$0xff]  }
  0xa3   :  { %1504 = vmatpush3.bf16.msra.mxu0 %v1690_v21  ;;  %1526 = vmatpush3.bf16.msra.mxu1 %v1691_v22  ;;  %v2180_v61 = vld [vmem:[#allocation4] sm:$0xf]  ;;  %v318_v0 = vld [vmem:[#allocation7] sm:$0xf] }
  0xa4   :  { %1505 = vmatprep.subr.bf16.mxu0 %v1692_v23  ;;  %1527 = vmatprep.subr.bf16.mxu1 %v1693_v24  ;;  %v167_v5 = vrot.slane %v2180_v61, %v166_v57  ;;  %v175_v6 = vrot.slane %v2180_v61, %v174_v59  ;;  %v323_v7 = vrot.slane %v318_v0, %v162_v1  ;;  %v1750_v54 = vld [vmem:[#allocation9 + $0x38] sm:$0xff]  }
  0xa5   :  { %v331_v8 = vrot.slane %v318_v0, %v170_v2  ;;  %v327_v9 = vrot.slane %v318_v0, %v166_v57  ;;  %v335_v10 = vrot.slane %v318_v0, %v174_v59  ;;  %v1739_v57 = vld [vmem:[#allocation9 + $0xa0] sm:$0xff]   ;;  %v1741_v59 = vld [vmem:[#allocation9 + $0xe8] sm:$0xff]   ;;  %v171_v0 = vrot.slane %v2180_v61, %v170_v2 }
  0xa7   :  { %1506 = vmatpush3.bf16.msra.mxu0 %v1694_v25  ;;  %1528 = vmatpush3.bf16.msra.mxu1 %v1695_v26 }
  0xa8   :  { %1507 = vmatprep.subr.bf16.mxu0 %v1696_v27  ;;  %1529 = vmatprep.subr.bf16.mxu1 %v1697_v28 }
  0xab   :  { %1508 = vmatpush3.bf16.msra.mxu0 %v1698_v29  ;;  %1530 = vmatpush3.bf16.msra.mxu1 %v1699_v30 }
  0xac   :  { %1509 = vmatprep.subr.bf16.mxu0 %v1700_v31  ;;  %1531 = vmatprep.subr.bf16.mxu1 %v1701_v32 }
  0xaf   :  { %1510 = vmatpush3.bf16.msra.mxu0 %v1702_v33  ;;  %1532 = vmatpush3.bf16.msra.mxu1 %v1703_v34  ;;  %v1722_v34 = vld [vmem:[#allocation9] sm:$0xff]  }
  0xb0   :  { %1511 = vmatprep.subr.bf16.mxu0 %v1704_v35  ;;  %1533 = vmatprep.subr.bf16.mxu1 %v1705_v36  ;;  %v1723_v35 = vld [vmem:[#allocation9 + $0x80] sm:$0xff]  }
  0xb3   :  { %1512 = vmatpush3.bf16.msra.mxu0 %v1706_v37  ;;  %1534 = vmatpush3.bf16.msra.mxu1 %v1707_v38  ;;  %v1724_v37 = vld [vmem:[#allocation9 + $0x48] sm:$0xff]  }
  0xb4   :  { %1513 = vmatprep.subr.bf16.mxu0 %v1708_v39  ;;  %1535 = vmatprep.subr.bf16.mxu1 %v1709_v40  ;;  %v1725_v38 = vld [vmem:[#allocation9 + $0xc8] sm:$0xff]  }
  0xb7   :  { %1514 = vmatpush3.bf16.msra.mxu0 %v1710_v41  ;;  %1536 = vmatpush3.bf16.msra.mxu1 %v1711_v42  ;;  %v1726_v41 = vld [vmem:[#allocation9 + $0x8] sm:$0xff]  }
  0xb8   :  { %1515 = vmatprep.subr.bf16.mxu0 %v1712_v43  ;;  %1537 = vmatprep.subr.bf16.mxu1 %v1713_v44  ;;  %v1727_v42 = vld [vmem:[#allocation9 + $0x88] sm:$0xff]   ;;  %v1728_v43 = vld [vmem:[#allocation9 + $0x50] sm:$0xff]  }
  0xb9   :  { %v1729_v44 = vld [vmem:[#allocation9 + $0xd0] sm:$0xff]  }
  0xbb   :  { %1516 = vmatpush3.bf16.msra.mxu0 %v1714_v45  ;;  %1538 = vmatpush3.bf16.msra.mxu1 %v1715_v46  ;;  %v1730_v45 = vld [vmem:[#allocation9 + $0x10] sm:$0xff]  }
  0xbc   :  { %1517 = vmatprep.subr.bf16.mxu0 %v1716_v47  ;;  %1539 = vmatprep.subr.bf16.mxu1 %v1717_v48  ;;  %v1731_v46 = vld [vmem:[#allocation9 + $0x90] sm:$0xff]   ;;  %v1732_v47 = vld [vmem:[#allocation9 + $0x58] sm:$0xff]  }
  0xbd   :  { %v1733_v48 = vld [vmem:[#allocation9 + $0xd8] sm:$0xff]  }
  0xbf   :  { %1518 = vmatpush3.bf16.msra.mxu0 %v1718_v49  ;;  %1540 = vmatpush3.bf16.msra.mxu1 %v1719_v50  ;;  %v1734_v49 = vld [vmem:[#allocation9 + $0x18] sm:$0xff]  }
  0xc0   :  { %1547 = vmatprep.subr.bf16.mxu0 %v1720_v51  ;;  %1569 = vmatprep.subr.bf16.mxu1 %v1721_v52  ;;  %v1735_v50 = vld [vmem:[#allocation9 + $0x98] sm:$0xff]   ;;  %v1736_v51 = vld [vmem:[#allocation9 + $0x60] sm:$0xff]  }
  0xc1   :  { %v1737_v52 = vld [vmem:[#allocation9 + $0xe0] sm:$0xff]  }
 0x16d   :  { %v2174_v55 = vpop.f32.mrb[0].mxu0  ;;  %v2176_v56 = vpop.f32.mrb[0].mxu1 }
 0x16e   :  { %v260_v58 = vpop.f32.mrb[1].mxu0  ;;  %v301_v60 = vpop.f32.mrb[1].mxu1 }
 0x16f   :  { %v262_v62 = vpop.f32.mrb[2].mxu0  ;;  %v303_v63 = vpop.f32.mrb[2].mxu1  ;;  %v261_v13 = vadd.f32 %v260_v58, %v167_v5  ;;  %v302_v14 = vadd.f32 %v301_v60, %v175_v6  ;;  %v1740_v58 = vld [vmem:[#allocation9 + $0x68] sm:$0xff]   ;;  %v1746_v5 = vld [vmem:[#allocation9 + $0x30] sm:$0xff]  }
 0x170   :  { %v263_v3 = vpop.f32.mrb[3].mxu0  ;;  %v304_v4 = vpop.f32.mrb[3].mxu1  ;;  %v1742_v60 = vld [vmem:[#allocation9 + $0x28] sm:$0xff]   ;;  %v163_v63 = vrot.slane %v2180_v61, %v162_v1  ;;  %v1747_v6 = vld [vmem:[#allocation9 + $0xb0] sm:$0xff]   ;;  %v1749_v1 = vld [vmem:[#allocation9 + $0xf8] sm:$0xff]  }
 0x171   :  { %v307_v29 = vmax.f32 %v261_v13, 0.0  ;;  %v309_v30 = vmax.f32 %v302_v14, 0.0  ;;  %v1743_v62 = vld [vmem:[#allocation9 + $0xa8] sm:$0xff]   ;;  %v1744_v3 = vld [vmem:[#allocation9 + $0x70] sm:$0xff]   ;;  %v1751_v61 = vld [vmem:[#allocation9 + $0xb8] sm:$0xff]  }
 0x172   :  { %v1745_v4 = vld [vmem:[#allocation9 + $0xf0] sm:$0xff]   ;;  %v1753_v13 = vld [vmem:[#allocation12 + $0x8] sm:$0xff]  }
 0x173   :  { %v470_v39 = vpack.c.bf16 %v307_v29, %v307_v29  ;;  %v472_v40 = vpack.c.bf16 %v309_v30, %v309_v30  ;;  %v1754_v14 = vld [vmem:[#allocation12 + $0x10] sm:$0xff]  }
 0x175   :  { %v417_v11 = vpop.f32.mrb[4].mxu0  ;;  %v458_v12 = vpop.f32.mrb[4].mxu1 }
 0x176   :  { %v418_v15 = vadd.f32 %v417_v11, %v323_v7  ;;  %v459_v16 = vadd.f32 %v458_v12, %v331_v8  ;;  %v419_v17 = vpop.f32.mrb[5].mxu0  ;;  %v460_v18 = vpop.f32.mrb[5].mxu1  ;;  %v259_v7 = vadd.f32 %v2174_v55, %v163_v63  ;;  %v300_v8 = vadd.f32 %v2176_v56, %v171_v0  ;;  %v1752_v55 = vld [vmem:[#allocation12] sm:$0xff]  }
 0x177   :  { %v420_v19 = vadd.f32 %v419_v17, %v327_v9  ;;  %v461_v20 = vadd.f32 %v460_v18, %v335_v10  ;;  %v421_v21 = vpop.f32.mrb[6].mxu0  ;;  %v462_v22 = vpop.f32.mrb[6].mxu1  ;;  %v1748_v9 = vld [vmem:[#allocation9 + $0x78] sm:$0xff]   ;;  %v1971_v56 = vmov 0.0   ;;  %v1757_v17 = vld [vmem:[#allocation12 + $0x28] sm:$0xff]   ;;  %v1758_v18 = vld [vmem:[#allocation12 + $0x30] sm:$0xff]  }
 0x178   :  { %v465_v23 = vmax.f32 %v418_v15, 0.0  ;;  %v467_v24 = vmax.f32 %v459_v16, 0.0  ;;  %v422_v25 = vpop.f32.mrb[7].mxu0  ;;  %v463_v26 = vpop.f32.mrb[7].mxu1  ;;  %v306_v2 = vmax.f32 %v259_v7, 0.0  ;;  %v308_v10 = vmax.f32 %v300_v8, 0.0 }
 0x179   :  { %v466_v27 = vmax.f32 %v420_v19, 0.0  ;;  %v468_v28 = vmax.f32 %v461_v20, 0.0  ;;  %v1755_v15 = vld [vmem:[#allocation12 + $0x18] sm:$0xff]   ;;  %v1756_v16 = vld [vmem:[#allocation12 + $0x20] sm:$0xff]   ;;  %v1762_v22 = vld [vmem:[%s2260_s11 + $0x10] sm:$0xff]  }
 0x17a   :  { %v539_v31 = vpack.c.bf16 %v467_v24, %v467_v24  ;;  %v537_v36 = vpack.c.bf16 %v465_v23, %v465_v23  ;;  %v469_v11 = vpack.c.bf16 %v306_v2, %v306_v2  ;;  %v471_v12 = vpack.c.bf16 %v308_v10, %v308_v10  ;;  %v1759_v19 = vld [vmem:[#allocation12 + $0x38] sm:$0xff]   ;;  %v1761_v21 = vld [vmem:[%s2260_s11 + $0x8] sm:$0xff]   ;;  %v1763_v23 = vld [vmem:[%s2260_s11 + $0x18] sm:$0xff]  }
 0x17b   :  { %v538_v32 = vpack.c.bf16 %v466_v27, %v466_v27  ;;  %v540_v33 = vpack.c.bf16 %v468_v28, %v468_v28  ;;  %v1760_v20 = vld [vmem:[%s2260_s11] sm:$0xff]   ;;  %v1765_v25 = vld [vmem:[%s2260_s11 + $0x28] sm:$0xff]  }
 0x17c   :  { %v1764_v24 = vld [vmem:[%s2260_s11 + $0x20] sm:$0xff]  }
 0x17d   :  { %829 = vmatprep.mubr.bf16.mxu0 %v538_v32  ;;  %869 = vmatprep.mubr.bf16.mxu1 %v540_v33 }
 0x17e   :  { %830 = vmatmul.mubr.bf16.vlgmr.msra.gmra.mrb[8].mxu0 %v537_v36  ;;  %870 = vmatmul.mubr.bf16.vlgmr.msra.gmra.mrb[8].mxu1 %v539_v31 }
 0x17f   :  { %1548 = vmatpush3.bf16.msra.mxu0 %v1722_v34  ;;  %1570 = vmatpush3.bf16.msra.mxu1 %v1723_v35 }
 0x180   :  { %1101 = vmatprep.mubr.bf16.mxu0 %v470_v39  ;;  %1141 = vmatprep.mubr.bf16.mxu1 %v472_v40 }
 0x181   :  { %1549 = vmatprep.subr.bf16.mxu0 %v1724_v37  ;;  %1571 = vmatprep.subr.bf16.mxu1 %v1725_v38 }
 0x183   :  { %1550 = vmatpush3.bf16.msra.mxu0 %v1726_v41  ;;  %1572 = vmatpush3.bf16.msra.mxu1 %v1727_v42 }
 0x184   :  { %1551 = vmatprep.subr.bf16.mxu0 %v1728_v43  ;;  %1573 = vmatprep.subr.bf16.mxu1 %v1729_v44 }
 0x187   :  { %1552 = vmatpush3.bf16.msra.mxu0 %v1730_v45  ;;  %1574 = vmatpush3.bf16.msra.mxu1 %v1731_v46 }
 0x188   :  { %1553 = vmatprep.subr.bf16.mxu0 %v1732_v47  ;;  %1575 = vmatprep.subr.bf16.mxu1 %v1733_v48  ;;  %v1483_v48 = vld [vmem:[%s2257_s8] ss:$0 sm:$0xff] }
 0x18b   :  { %1554 = vmatpush3.bf16.msra.mxu0 %v1734_v49  ;;  %1576 = vmatpush3.bf16.msra.mxu1 %v1735_v50 }
 0x18c   :  { %1555 = vmatprep.subr.bf16.mxu0 %v1736_v51  ;;  %1577 = vmatprep.subr.bf16.mxu1 %v1737_v52 }
 0x18f   :  { %1556 = vmatpush3.bf16.msra.mxu0 %v1738_v53  ;;  %1578 = vmatpush3.bf16.msra.mxu1 %v1739_v57  ;;  %v1766_v53 = vld [vmem:[%s2260_s11 + $0x30] sm:$0xff]   ;;  %v1767_v57 = vld [vmem:[%s2260_s11 + $0x38] sm:$0xff]  }
 0x190   :  { %1557 = vmatprep.subr.bf16.mxu0 %v1740_v58  ;;  %1579 = vmatprep.subr.bf16.mxu1 %v1741_v59  ;;  %v1484_v58 = vld [vmem:[#allocation13] ss:$0 sm:$0xff] }
 0x193   :  { %1558 = vmatpush3.bf16.msra.mxu0 %v1742_v60  ;;  %1580 = vmatpush3.bf16.msra.mxu1 %v1743_v62 }
 0x194   :  { %1559 = vmatprep.subr.bf16.mxu0 %v1744_v3  ;;  %1581 = vmatprep.subr.bf16.mxu1 %v1745_v4 }
 0x197   :  { %1560 = vmatpush3.bf16.msra.mxu0 %v1746_v5  ;;  %1582 = vmatpush3.bf16.msra.mxu1 %v1747_v6  ;;  %v1493_v5 = vld [vmem:[%s2261_s12] ss:$0 sm:$0xff] }
 0x198   :  { %1561 = vmatprep.subr.bf16.mxu0 %v1748_v9  ;;  %1583 = vmatprep.subr.bf16.mxu1 %v1749_v1 }
 0x19b   :  { %1562 = vmatpush3.bf16.msra.mxu0 %v1750_v54  ;;  %1584 = vmatpush3.bf16.msra.mxu1 %v1751_v61 }
 0x19c   :  { %1609 = vmatprep.subr.bf16.mxu0 %v1971_v56  ;;  %1629 = vmatprep.subr.bf16.mxu1 %v1971_v56 }
 0x19e   :  { %1102 = vmatmul.mubr.bf16.vlgmr.msra.gmra.mrb[12].mxu0 %v469_v11  ;;  %1142 = vmatmul.mubr.bf16.vlgmr.msra.gmra.mrb[12].mxu1 %v471_v12 }
 0x19f   :  { %1610 = vmatpush3.bf16.msra.mxu0 %v1752_v55  ;;  %1625 = vmatprep.mubr.msk.bf16.mxu0 %vm1972_vm1, %v1971_v56 }
 0x1a0   :  { %1611 = vmatprep.subr.bf16.mxu0 %v1971_v56  ;;  %1645 = vmatprep.mubr.msk.bf16.mxu1 %vm1972_vm1, %v1971_v56 }
 0x1a1   :  { %1630 = vmatpush3.bf16.msra.mxu1 %v1760_v20 }
 0x1a2   :  { %1631 = vmatprep.subr.bf16.mxu1 %v1971_v56 }
 0x1a3   :  { %1612 = vmatpush3.bf16.msra.mxu0 %v1753_v13 }
 0x1a4   :  { %1613 = vmatprep.subr.bf16.mxu0 %v1971_v56 }
 0x1a5   :  { %1632 = vmatpush3.bf16.msra.mxu1 %v1761_v21 }
 0x1a6   :  { %1633 = vmatprep.subr.bf16.mxu1 %v1971_v56 }
 0x1a7   :  { %1614 = vmatpush3.bf16.msra.mxu0 %v1754_v14 }
 0x1a8   :  { %1615 = vmatprep.subr.bf16.mxu0 %v1971_v56 }
 0x1a9   :  { %1634 = vmatpush3.bf16.msra.mxu1 %v1762_v22 }
 0x1aa   :  { %1635 = vmatprep.subr.bf16.mxu1 %v1971_v56 }
 0x1ab   :  { %1616 = vmatpush3.bf16.msra.mxu0 %v1755_v15 }
 0x1ac   :  { %1617 = vmatprep.subr.bf16.mxu0 %v1971_v56 }
 0x1ad   :  { %1636 = vmatpush3.bf16.msra.mxu1 %v1763_v23 }
 0x1ae   :  { %1637 = vmatprep.subr.bf16.mxu1 %v1971_v56 }
 0x1af   :  { %1618 = vmatpush3.bf16.msra.mxu0 %v1756_v16 }
 0x1b0   :  { %1619 = vmatprep.subr.bf16.mxu0 %v1971_v56 }
 0x1b1   :  { %1638 = vmatpush3.bf16.msra.mxu1 %v1764_v24 }
 0x1b2   :  { %1639 = vmatprep.subr.bf16.mxu1 %v1971_v56 }
 0x1b3   :  { %1620 = vmatpush3.bf16.msra.mxu0 %v1757_v17 }
 0x1b4   :  { %1621 = vmatprep.subr.bf16.mxu0 %v1971_v56 }
 0x1b5   :  { %1640 = vmatpush3.bf16.msra.mxu1 %v1765_v25 }
 0x1b6   :  { %1641 = vmatprep.subr.bf16.mxu1 %v1971_v56 }
 0x1b7   :  { %1622 = vmatpush3.bf16.msra.mxu0 %v1758_v18 }
 0x1b8   :  { %1623 = vmatprep.subr.bf16.mxu0 %v1971_v56 }
 0x1b9   :  { %1642 = vmatpush3.bf16.msra.mxu1 %v1766_v53 }
 0x1ba   :  { %1643 = vmatprep.subr.bf16.mxu1 %v1971_v56 }
 0x1bb   :  { %1624 = vmatpush3.bf16.msra.mxu0 %v1759_v19 }
 0x1bd   :  { %1644 = vmatpush3.bf16.msra.mxu1 %v1767_v57 }
 0x251   :  { %v1519_v26 = vpop.f32.mrb[8].mxu0  ;;  %v1541_v27 = vpop.f32.mrb[8].mxu1 }
 0x252   :  { %v1520_v28 = vpop.f32.mrb[9].mxu0  ;;  %v1542_v29 = vpop.f32.mrb[9].mxu1 }
 0x253   :  { %v1521_v30 = vadd.f32 %v1520_v28, %v1519_v26  ;;  %v1543_v31 = vadd.f32 %v1542_v29, %v1541_v27  ;;  %v1522_v32 = vpop.f32.mrb[10].mxu0  ;;  %v1544_v33 = vpop.f32.mrb[10].mxu1 }
 0x254   :  { %v1523_v34 = vpop.f32.mrb[11].mxu0  ;;  %v1545_v35 = vpop.f32.mrb[11].mxu1 }
 0x255   :  { %v872_v36 = vadd.f32 %v1543_v31, %v1521_v30 }
 0x271   :  { %v1563_v37 = vpop.f32.mrb[12].mxu0  ;;  %v1585_v38 = vpop.f32.mrb[12].mxu1 }
 0x272   :  { %v1564_v39 = vpop.f32.mrb[13].mxu0  ;;  %v1586_v40 = vpop.f32.mrb[13].mxu1 }
 0x273   :  { %v1565_v41 = vadd.f32 %v1564_v39, %v1563_v37  ;;  %v1587_v42 = vadd.f32 %v1586_v40, %v1585_v38  ;;  %v1566_v43 = vpop.f32.mrb[14].mxu0  ;;  %v1588_v44 = vpop.f32.mrb[14].mxu1 }
 0x274   :  { %v1567_v45 = vpop.f32.mrb[15].mxu0  ;;  %v1589_v46 = vpop.f32.mrb[15].mxu1 }
 0x275   :  { %v1104_v47 = vadd.f32 %v1565_v41, %v872_v36 }
 0x277   :  { %v1144_v49 = vadd.f32 %v1587_v42, %v1104_v47 }
 0x279   :  { %v1156_v50 = vadd.f32 %v1483_v48, %v1144_v49 }
 0x27b   :  { %v1157_v51 = vmax.f32 %v1156_v50, 0.0 }
 0x27d   :  { %v1158_v52 = vpack.c.bf16 %v1157_v51, %v1157_v51 }
 0x27f   :  { %1626 = vmatmul.mubr.bf16.vlgmr.msra.gmra.mrb[16].mxu0 %v1158_v52 }
 0x352   :  { %v1264_v59 = vpop.f32.mrb[16].mxu0 }
 0x353   :  { %v1265_v60 = vadd.f32 %v1484_v58, %v1264_v59  ;;  %v1627_v62 = vpop.f32.mrb[17].mxu0 }
 0x354   :  { %v1267_v63 = vpop.f32.mrb[18].mxu0 }
 0x355   :  { %v1270_v0 = vmax.f32 %v1265_v60, 0.0  ;;  %v1628_v3 = vpop.f32.mrb[19].mxu0 }
 0x357   :  { %v1271_v4 = vpack.c.bf16 %v1270_v0, %v1270_v0 }
 0x359   :  { %1646 = vmatmul.mubr.bf16.vlgmr.msra.gmra.mrb[16].mxu1 %v1271_v4 }
 0x42c   :  { %v1377_v6 = vpop.f32.mrb[16].mxu1 }
 0x42d   :  { %v1378_v7 = vadd.f32 %v1493_v5, %v1377_v6  ;;  %v1647_v8 = vpop.f32.mrb[17].mxu1 }
 0x42e   :  { %v1380_v9 = vpop.f32.mrb[18].mxu1 }
 0x42f   :  { %v1502_v1 = vmul.f32 -1.442695, %v1378_v7  ;;  %v1648_v54 = vpop.f32.mrb[19].mxu1 }
 0x431   :  { %1768 = vpow2.f32 %v1502_v1 }
 0x43b   :  { %v1769_v61 = vpop.eup %1768 }
 0x43c   :  { %v1386_v2 = vadd.f32 1.0, %v1769_v61 }
 0x43e   :  { %1770 = vrcp.f32 %v1386_v2 }
 0x448   :  { %v1771_v10 = vpop.eup %1770 }
 0x449   :  { %1389 = vst [vmem:[%s2262_s13] sm:$0xff] %v1771_v10 }
 0x44a   :  { %1394 = vsyncpa [#allocation3], 1 }
 0x44b   :  { %1395 = vsyncpa [#allocation5], 1 }
 0x44c   :  { %1396 = vsyncpa [#allocation8], 1 }
 0x44d   :  { %1397 = vsyncpa [#allocation11], 1 }
 0x44e   :  { %1398 = vsyncpa [#allocation14], 1 }

</bundles_post_ra>
